<compile_context>
chip_gen: v7x
topology: tpu7x:2x2x1
jax: 0.10.0
libtpu: 0.0.40
codegen_flags: <defaults>
</compile_context>

<pallas_src>
import math
import jax
import jax.numpy as jnp
import numpy as np
from jax.experimental import pallas as pl
from jax.experimental.pallas import tpu as pltpu


# Packed parameter layout (flat f32, PyTorch storage order):
#   w1: NoisyLinear.w        (nin=2, nout=4) row-major      -> [ 0,  8)
#   b1: NoisyLinear.b        (4,)                           -> [ 8, 12)
#   w2: nn.Linear(4,4).weight (out=4, in=4) row-major       -> [12, 28)
#   b2: nn.Linear(4,4).bias   (4,)                          -> [28, 32)
#   w3: nn.Linear(4,1).weight (1, 4)                        -> [32, 36)
#   b3: nn.Linear(4,1).bias   (1,)                          -> [36, 37)
_W1, _B1, _W2, _B2, _W3, _B3 = 0, 8, 12, 28, 32, 36
_NPARAMS = 37


def mlp_kernel(p_ref, x_ref, o_ref):
    # x_ref: (2, TB)  -- input features on sublanes, batch on lanes
    # p_ref: (37,)    -- packed weights/biases in SMEM (scalar reads)
    # o_ref: (1, TB)  -- lane-dense output
    x = x_ref[...]  # (2, TB) f32

    # Layer 1: NoisyLinear(2 -> 4), eval path (mu only), then ReLU.
    # h1[j] = relu( sum_k w1[k, j] * x[k, :] + b1[j] )   (8 FMAs total)
    h1 = []
    for j in range(4):
        acc = p_ref[_W1 + 0 * 4 + j] * x[0:1, :]
        acc = acc + p_ref[_W1 + 1 * 4 + j] * x[1:2, :]
        acc = acc + p_ref[_B1 + j]
        h1.append(jnp.maximum(acc, 0.0))

    # Layer 2: Linear(4 -> 4) + ReLU.  h2[j] = relu( sum_k w2[j, k] * h1[k] + b2[j] )
    h2 = []
    for j in range(4):
        acc = p_ref[_W2 + j * 4 + 0] * h1[0]
        for k in range(1, 4):
            acc = acc + p_ref[_W2 + j * 4 + k] * h1[k]
        acc = acc + p_ref[_B2 + j]
        h2.append(jnp.maximum(acc, 0.0))

    # Layer 3: Linear(4 -> 1) + Sigmoid.  z = sum_k w3[0, k] * h2[k] + b3
    z = p_ref[_W3 + 0] * h2[0]
    for k in range(1, 4):
        z = z + p_ref[_W3 + k] * h2[k]
    z = z + p_ref[_B3]

    # Numerically stable sigmoid: exp on EUP, single divide, VPU select.
    e = jnp.exp(-jnp.abs(z))
    inv = 1.0 / (1.0 + e)
    o_ref[...] = jnp.where(z >= 0.0, inv, e * inv)


def pack_params(params):
    w1, b1, w2, b2, w3, b3 = params
    return jnp.concatenate(
        [w1.reshape(-1), b1.reshape(-1), w2.reshape(-1),
         b2.reshape(-1), w3.reshape(-1), b3.reshape(-1)]
    ).astype(jnp.float32)


def my_noisy_module_forward(x, params, tb=512):
    """x: (n, 2) f32 -> (n, 1) f32, matching MyNoisyModule.forward(x, training=False)."""
    n, nin = x.shape
    assert nin == 2

    # Batch tile: multiple of 128 lanes; don't over-tile tiny batches.
    tb = max(128, min(tb, pl.cdiv(n, 128) * 128))
    n_pad = pl.cdiv(n, tb) * tb
    grid = (n_pad // tb,)

    # Batch-on-lanes transpose + zero-pad the batch to a tile multiple.
    xt = jnp.zeros((2, n_pad), jnp.float32).at[:, :n].set(x.astype(jnp.float32).T)
    packed = pack_params(params)  # (37,) f32 -> SMEM, one tiny DMA

    out_t = pl.pallas_call(
        mlp_kernel,
        out_shape=jax.ShapeDtypeStruct((1, n_pad), jnp.float32),
        grid=grid,
        in_specs=[
            pl.BlockSpec(memory_space=pltpu.MemorySpace.SMEM),     # packed params
            pl.BlockSpec((2, tb), lambda i: (0, i)),               # x tile (2, TB)
        ],
        out_specs=pl.BlockSpec((1, tb), lambda i: (0, i)),         # lane-dense output
        compiler_params=pltpu.CompilerParams(
            dimension_semantics=("parallel",),   # shards batch tiles across TCs on v7x
        ),
    )(packed, xt)

    return out_t[:, :n].T  # back to PyTorch's (n, 1)


def init_params(key):
    """PyTorch-layout parameters."""
    k1, k2, k3, k4, k5 = jax.random.split(key, 5)
    # NoisyLinear(2, 4): w shape (nin, nout)=(2,4), xavier_uniform; b zeros
    bound1 = math.sqrt(6.0 / (2 + 4))
    w1 = jax.random.uniform(k1, (2, 4), jnp.float32, -bound1, bound1)
    b1 = jnp.zeros((4,), jnp.float32)
    # nn.Linear(4, 4): weight (out,in)=(4,4), uniform(-1/sqrt(fan_in), 1/sqrt(fan_in))
    bound2 = 1.0 / math.sqrt(4.0)
    w2 = jax.random.uniform(k2, (4, 4), jnp.float32, -bound2, bound2)
    b2 = jax.random.uniform(k3, (4,), jnp.float32, -bound2, bound2)
    # nn.Linear(4, 1): weight (1, 4)
    bound3 = 1.0 / math.sqrt(4.0)
    w3 = jax.random.uniform(k4, (1, 4), jnp.float32, -bound3, bound3)
    b3 = jax.random.uniform(k5, (1,), jnp.float32, -bound3, bound3)
    return (w1, b1, w2, b2, w3, b3)


def reference_forward(x, params):
    """Pure-JAX reference with PyTorch semantics (eval mode, no noise)."""
    w1, b1, w2, b2, w3, b3 = params
    h1 = jnp.maximum(x @ w1 + b1, 0.0)          # NoisyLinear: mm(x, w) + b
    h2 = jnp.maximum(h1 @ w2.T + b2, 0.0)       # nn.Linear: x @ W.T + b
    return jax.nn.sigmoid(h2 @ w3.T + b3)       # (n, 1)


if __name__ == "__main__":
    key = jax.random.PRNGKey(0)
    kp, kx = jax.random.split(key)
    params = init_params(kp)

    # batch=8, in_features=2 (XOR-style input)
    x = jax.random.uniform(kx, (8, 2), jnp.float32)

    out = jax.block_until_ready(my_noisy_module_forward(x, params))
    ref = jax.block_until_ready(reference_forward(x, params))
    np.testing.assert_allclose(np.asarray(out), np.asarray(ref), rtol=1e-5, atol=1e-5)

    print("KERNEL_OK")
</pallas_src>

<mosaic_0001>
module attributes {stable_mosaic.version = 11 : i64} {
  func.func @mlp_kernel(%arg0: i32, %arg1: memref<37xf32, #tpu.memory_space<smem>>, %arg2: memref<2x128xf32, #tpu.memory_space<vmem>>, %arg3: memref<1x128xf32, #tpu.memory_space<vmem>>) attributes {dimension_semantics = [#tpu.dimension_semantics<parallel>], iteration_bounds = array<i64: 1>, scalar_prefetch = 0 : i64, scratch_operands = 0 : i64, tpu.core_type = #tpu.core_type<tc>, window_params = [{transform_indices = @transform_0, window_bounds = array<i64: 37>}, {transform_indices = @transform_1, window_bounds = array<i64: 2, 128>}, {transform_indices = @transform_2, window_bounds = array<i64: 1, 128>}]} {
    %c0 = arith.constant 0 : index
    %c0_0 = arith.constant 0 : index
    %0 = vector.load %arg2[%c0, %c0_0] : memref<2x128xf32, #tpu.memory_space<vmem>>, vector<2x128xf32>
    %c0_1 = arith.constant 0 : index
    %1 = memref.load %arg1[%c0_1] : memref<37xf32, #tpu.memory_space<smem>>
    %2 = vector.extract_strided_slice %0 {offsets = [0, 0], sizes = [1, 128], strides = [1, 1]} : vector<2x128xf32> to vector<1x128xf32>
    %3 = vector.broadcast %1 : f32 to vector<1x128xf32>
    %4 = arith.mulf %3, %2 : vector<1x128xf32>
    %c4 = arith.constant 4 : index
    %5 = memref.load %arg1[%c4] : memref<37xf32, #tpu.memory_space<smem>>
    %6 = vector.extract_strided_slice %0 {offsets = [1, 0], sizes = [1, 128], strides = [1, 1]} : vector<2x128xf32> to vector<1x128xf32>
    %7 = vector.broadcast %5 : f32 to vector<1x128xf32>
    %8 = arith.mulf %7, %6 : vector<1x128xf32>
    %9 = arith.addf %4, %8 : vector<1x128xf32>
    %c8 = arith.constant 8 : index
    %10 = memref.load %arg1[%c8] : memref<37xf32, #tpu.memory_space<smem>>
    %11 = vector.broadcast %10 : f32 to vector<1x128xf32>
    %12 = arith.addf %9, %11 : vector<1x128xf32>
    %cst = arith.constant 0.000000e+00 : f32
    %13 = vector.broadcast %cst : f32 to vector<1x128xf32>
    %14 = arith.maximumf %12, %13 : vector<1x128xf32>
    %c1 = arith.constant 1 : index
    %15 = memref.load %arg1[%c1] : memref<37xf32, #tpu.memory_space<smem>>
    %16 = vector.extract_strided_slice %0 {offsets = [0, 0], sizes = [1, 128], strides = [1, 1]} : vector<2x128xf32> to vector<1x128xf32>
    %17 = vector.broadcast %15 : f32 to vector<1x128xf32>
    %18 = arith.mulf %17, %16 : vector<1x128xf32>
    %c5 = arith.constant 5 : index
    %19 = memref.load %arg1[%c5] : memref<37xf32, #tpu.memory_space<smem>>
    %20 = vector.extract_strided_slice %0 {offsets = [1, 0], sizes = [1, 128], strides = [1, 1]} : vector<2x128xf32> to vector<1x128xf32>
    %21 = vector.broadcast %19 : f32 to vector<1x128xf32>
    %22 = arith.mulf %21, %20 : vector<1x128xf32>
    %23 = arith.addf %18, %22 : vector<1x128xf32>
    %c9 = arith.constant 9 : index
    %24 = memref.load %arg1[%c9] : memref<37xf32, #tpu.memory_space<smem>>
    %25 = vector.broadcast %24 : f32 to vector<1x128xf32>
    %26 = arith.addf %23, %25 : vector<1x128xf32>
    %cst_2 = arith.constant 0.000000e+00 : f32
    %27 = vector.broadcast %cst_2 : f32 to vector<1x128xf32>
    %28 = arith.maximumf %26, %27 : vector<1x128xf32>
    %c2 = arith.constant 2 : index
    %29 = memref.load %arg1[%c2] : memref<37xf32, #tpu.memory_space<smem>>
    %30 = vector.extract_strided_slice %0 {offsets = [0, 0], sizes = [1, 128], strides = [1, 1]} : vector<2x128xf32> to vector<1x128xf32>
    %31 = vector.broadcast %29 : f32 to vector<1x128xf32>
    %32 = arith.mulf %31, %30 : vector<1x128xf32>
    %c6 = arith.constant 6 : index
    %33 = memref.load %arg1[%c6] : memref<37xf32, #tpu.memory_space<smem>>
    %34 = vector.extract_strided_slice %0 {offsets = [1, 0], sizes = [1, 128], strides = [1, 1]} : vector<2x128xf32> to vector<1x128xf32>
    %35 = vector.broadcast %33 : f32 to vector<1x128xf32>
    %36 = arith.mulf %35, %34 : vector<1x128xf32>
    %37 = arith.addf %32, %36 : vector<1x128xf32>
    %c10 = arith.constant 10 : index
    %38 = memref.load %arg1[%c10] : memref<37xf32, #tpu.memory_space<smem>>
    %39 = vector.broadcast %38 : f32 to vector<1x128xf32>
    %40 = arith.addf %37, %39 : vector<1x128xf32>
    %cst_3 = arith.constant 0.000000e+00 : f32
    %41 = vector.broadcast %cst_3 : f32 to vector<1x128xf32>
    %42 = arith.maximumf %40, %41 : vector<1x128xf32>
    %c3 = arith.constant 3 : index
    %43 = memref.load %arg1[%c3] : memref<37xf32, #tpu.memory_space<smem>>
    %44 = vector.extract_strided_slice %0 {offsets = [0, 0], sizes = [1, 128], strides = [1, 1]} : vector<2x128xf32> to vector<1x128xf32>
    %45 = vector.broadcast %43 : f32 to vector<1x128xf32>
    %46 = arith.mulf %45, %44 : vector<1x128xf32>
    %c7 = arith.constant 7 : index
    %47 = memref.load %arg1[%c7] : memref<37xf32, #tpu.memory_space<smem>>
    %48 = vector.extract_strided_slice %0 {offsets = [1, 0], sizes = [1, 128], strides = [1, 1]} : vector<2x128xf32> to vector<1x128xf32>
    %49 = vector.broadcast %47 : f32 to vector<1x128xf32>
    %50 = arith.mulf %49, %48 : vector<1x128xf32>
    %51 = arith.addf %46, %50 : vector<1x128xf32>
    %c11 = arith.constant 11 : index
    %52 = memref.load %arg1[%c11] : memref<37xf32, #tpu.memory_space<smem>>
    %53 = vector.broadcast %52 : f32 to vector<1x128xf32>
    %54 = arith.addf %51, %53 : vector<1x128xf32>
    %cst_4 = arith.constant 0.000000e+00 : f32
    %55 = vector.broadcast %cst_4 : f32 to vector<1x128xf32>
    %56 = arith.maximumf %54, %55 : vector<1x128xf32>
    %c12 = arith.constant 12 : index
    %57 = memref.load %arg1[%c12] : memref<37xf32, #tpu.memory_space<smem>>
    %58 = vector.broadcast %57 : f32 to vector<1x128xf32>
    %59 = arith.mulf %58, %14 : vector<1x128xf32>
    %c13 = arith.constant 13 : index
    %60 = memref.load %arg1[%c13] : memref<37xf32, #tpu.memory_space<smem>>
    %61 = vector.broadcast %60 : f32 to vector<1x128xf32>
    %62 = arith.mulf %61, %28 : vector<1x128xf32>
    %63 = arith.addf %59, %62 : vector<1x128xf32>
    %c14 = arith.constant 14 : index
    %64 = memref.load %arg1[%c14] : memref<37xf32, #tpu.memory_space<smem>>
    %65 = vector.broadcast %64 : f32 to vector<1x128xf32>
    %66 = arith.mulf %65, %42 : vector<1x128xf32>
    %67 = arith.addf %63, %66 : vector<1x128xf32>
    %c15 = arith.constant 15 : index
    %68 = memref.load %arg1[%c15] : memref<37xf32, #tpu.memory_space<smem>>
    %69 = vector.broadcast %68 : f32 to vector<1x128xf32>
    %70 = arith.mulf %69, %56 : vector<1x128xf32>
    %71 = arith.addf %67, %70 : vector<1x128xf32>
    %c28 = arith.constant 28 : index
    %72 = memref.load %arg1[%c28] : memref<37xf32, #tpu.memory_space<smem>>
    %73 = vector.broadcast %72 : f32 to vector<1x128xf32>
    %74 = arith.addf %71, %73 : vector<1x128xf32>
    %cst_5 = arith.constant 0.000000e+00 : f32
    %75 = vector.broadcast %cst_5 : f32 to vector<1x128xf32>
    %76 = arith.maximumf %74, %75 : vector<1x128xf32>
    %c16 = arith.constant 16 : index
    %77 = memref.load %arg1[%c16] : memref<37xf32, #tpu.memory_space<smem>>
    %78 = vector.broadcast %77 : f32 to vector<1x128xf32>
    %79 = arith.mulf %78, %14 : vector<1x128xf32>
    %c17 = arith.constant 17 : index
    %80 = memref.load %arg1[%c17] : memref<37xf32, #tpu.memory_space<smem>>
    %81 = vector.broadcast %80 : f32 to vector<1x128xf32>
    %82 = arith.mulf %81, %28 : vector<1x128xf32>
    %83 = arith.addf %79, %82 : vector<1x128xf32>
    %c18 = arith.constant 18 : index
    %84 = memref.load %arg1[%c18] : memref<37xf32, #tpu.memory_space<smem>>
    %85 = vector.broadcast %84 : f32 to vector<1x128xf32>
    %86 = arith.mulf %85, %42 : vector<1x128xf32>
    %87 = arith.addf %83, %86 : vector<1x128xf32>
    %c19 = arith.constant 19 : index
    %88 = memref.load %arg1[%c19] : memref<37xf32, #tpu.memory_space<smem>>
    %89 = vector.broadcast %88 : f32 to vector<1x128xf32>
    %90 = arith.mulf %89, %56 : vector<1x128xf32>
    %91 = arith.addf %87, %90 : vector<1x128xf32>
    %c29 = arith.constant 29 : index
    %92 = memref.load %arg1[%c29] : memref<37xf32, #tpu.memory_space<smem>>
    %93 = vector.broadcast %92 : f32 to vector<1x128xf32>
    %94 = arith.addf %91, %93 : vector<1x128xf32>
    %cst_6 = arith.constant 0.000000e+00 : f32
    %95 = vector.broadcast %cst_6 : f32 to vector<1x128xf32>
    %96 = arith.maximumf %94, %95 : vector<1x128xf32>
    %c20 = arith.constant 20 : index
    %97 = memref.load %arg1[%c20] : memref<37xf32, #tpu.memory_space<smem>>
    %98 = vector.broadcast %97 : f32 to vector<1x128xf32>
    %99 = arith.mulf %98, %14 : vector<1x128xf32>
    %c21 = arith.constant 21 : index
    %100 = memref.load %arg1[%c21] : memref<37xf32, #tpu.memory_space<smem>>
    %101 = vector.broadcast %100 : f32 to vector<1x128xf32>
    %102 = arith.mulf %101, %28 : vector<1x128xf32>
    %103 = arith.addf %99, %102 : vector<1x128xf32>
    %c22 = arith.constant 22 : index
    %104 = memref.load %arg1[%c22] : memref<37xf32, #tpu.memory_space<smem>>
    %105 = vector.broadcast %104 : f32 to vector<1x128xf32>
    %106 = arith.mulf %105, %42 : vector<1x128xf32>
    %107 = arith.addf %103, %106 : vector<1x128xf32>
    %c23 = arith.constant 23 : index
    %108 = memref.load %arg1[%c23] : memref<37xf32, #tpu.memory_space<smem>>
    %109 = vector.broadcast %108 : f32 to vector<1x128xf32>
    %110 = arith.mulf %109, %56 : vector<1x128xf32>
    %111 = arith.addf %107, %110 : vector<1x128xf32>
    %c30 = arith.constant 30 : index
    %112 = memref.load %arg1[%c30] : memref<37xf32, #tpu.memory_space<smem>>
    %113 = vector.broadcast %112 : f32 to vector<1x128xf32>
    %114 = arith.addf %111, %113 : vector<1x128xf32>
    %cst_7 = arith.constant 0.000000e+00 : f32
    %115 = vector.broadcast %cst_7 : f32 to vector<1x128xf32>
    %116 = arith.maximumf %114, %115 : vector<1x128xf32>
    %c24 = arith.constant 24 : index
    %117 = memref.load %arg1[%c24] : memref<37xf32, #tpu.memory_space<smem>>
    %118 = vector.broadcast %117 : f32 to vector<1x128xf32>
    %119 = arith.mulf %118, %14 : vector<1x128xf32>
    %c25 = arith.constant 25 : index
    %120 = memref.load %arg1[%c25] : memref<37xf32, #tpu.memory_space<smem>>
    %121 = vector.broadcast %120 : f32 to vector<1x128xf32>
    %122 = arith.mulf %121, %28 : vector<1x128xf32>
    %123 = arith.addf %119, %122 : vector<1x128xf32>
    %c26 = arith.constant 26 : index
    %124 = memref.load %arg1[%c26] : memref<37xf32, #tpu.memory_space<smem>>
    %125 = vector.broadcast %124 : f32 to vector<1x128xf32>
    %126 = arith.mulf %125, %42 : vector<1x128xf32>
    %127 = arith.addf %123, %126 : vector<1x128xf32>
    %c27 = arith.constant 27 : index
    %128 = memref.load %arg1[%c27] : memref<37xf32, #tpu.memory_space<smem>>
    %129 = vector.broadcast %128 : f32 to vector<1x128xf32>
    %130 = arith.mulf %129, %56 : vector<1x128xf32>
    %131 = arith.addf %127, %130 : vector<1x128xf32>
    %c31 = arith.constant 31 : index
    %132 = memref.load %arg1[%c31] : memref<37xf32, #tpu.memory_space<smem>>
    %133 = vector.broadcast %132 : f32 to vector<1x128xf32>
    %134 = arith.addf %131, %133 : vector<1x128xf32>
    %cst_8 = arith.constant 0.000000e+00 : f32
    %135 = vector.broadcast %cst_8 : f32 to vector<1x128xf32>
    %136 = arith.maximumf %134, %135 : vector<1x128xf32>
    %c32 = arith.constant 32 : index
    %137 = memref.load %arg1[%c32] : memref<37xf32, #tpu.memory_space<smem>>
    %138 = vector.broadcast %137 : f32 to vector<1x128xf32>
    %139 = arith.mulf %138, %76 : vector<1x128xf32>
    %c33 = arith.constant 33 : index
    %140 = memref.load %arg1[%c33] : memref<37xf32, #tpu.memory_space<smem>>
    %141 = vector.broadcast %140 : f32 to vector<1x128xf32>
    %142 = arith.mulf %141, %96 : vector<1x128xf32>
    %143 = arith.addf %139, %142 : vector<1x128xf32>
    %c34 = arith.constant 34 : index
    %144 = memref.load %arg1[%c34] : memref<37xf32, #tpu.memory_space<smem>>
    %145 = vector.broadcast %144 : f32 to vector<1x128xf32>
    %146 = arith.mulf %145, %116 : vector<1x128xf32>
    %147 = arith.addf %143, %146 : vector<1x128xf32>
    %c35 = arith.constant 35 : index
    %148 = memref.load %arg1[%c35] : memref<37xf32, #tpu.memory_space<smem>>
    %149 = vector.broadcast %148 : f32 to vector<1x128xf32>
    %150 = arith.mulf %149, %136 : vector<1x128xf32>
    %151 = arith.addf %147, %150 : vector<1x128xf32>
    %c36 = arith.constant 36 : index
    %152 = memref.load %arg1[%c36] : memref<37xf32, #tpu.memory_space<smem>>
    %153 = vector.broadcast %152 : f32 to vector<1x128xf32>
    %154 = arith.addf %151, %153 : vector<1x128xf32>
    %155 = math.absf %154 : vector<1x128xf32>
    %cst_9 = arith.constant 0.000000e+00 : f32
    %156 = vector.broadcast %cst_9 : f32 to vector<1x128xf32>
    %157 = arith.subf %156, %155 : vector<1x128xf32>
    %158 = math.exp %157 : vector<1x128xf32>
    %cst_10 = arith.constant 1.000000e+00 : f32
    %159 = vector.broadcast %cst_10 : f32 to vector<1x128xf32>
    %160 = arith.addf %159, %158 : vector<1x128xf32>
    %cst_11 = arith.constant 1.000000e+00 : f32
    %161 = vector.broadcast %cst_11 : f32 to vector<1x128xf32>
    %162 = arith.divf %161, %160 : vector<1x128xf32>
    %cst_12 = arith.constant 0.000000e+00 : f32
    %163 = vector.broadcast %cst_12 : f32 to vector<1x128xf32>
    %164 = arith.cmpf oge, %154, %163 : vector<1x128xf32>
    %165 = arith.mulf %158, %162 : vector<1x128xf32>
    %166 = arith.select %164, %162, %165 : vector<1x128xi1>, vector<1x128xf32>
    %c0_13 = arith.constant 0 : index
    %c0_14 = arith.constant 0 : index
    %167 = vector.load %arg3[%c0_13, %c0_14] : memref<1x128xf32, #tpu.memory_space<vmem>>, vector<1x128xf32>
    tpu.vector_store %arg3[%c0_13, %c0_14], %166 {strides = array<i32>} : memref<1x128xf32, #tpu.memory_space<vmem>>, vector<1x128xf32>,
    return
  }
  func.func @transform_0(%arg0: i32) -> i32 {
    %c0_i32 = arith.constant 0 : i32
    %c0_i32_0 = arith.constant 0 : i32
    return %c0_i32 : i32
  }
  func.func @transform_1(%arg0: i32) -> (i32, i32) {
    %c0_i32 = arith.constant 0 : i32
    %c0_i32_0 = arith.constant 0 : i32
    return %c0_i32, %arg0 : i32, i32
  }
  func.func @transform_2(%arg0: i32) -> (i32, i32) {
    %c0_i32 = arith.constant 0 : i32
    %c0_i32_0 = arith.constant 0 : i32
    return %c0_i32, %arg0 : i32, i32
  }
}

</mosaic_0001>

<bundles_post_ra>
// kernel: tpu_custom_call.1
= control target key start
LH: loop header
LB: loop body
LE: loop exit
PB: predicated region body
PF: predicated region fallthrough
CT: control target
= control target key end

     0   :  { %7 = vsyncpa [#allocation4], 0  ;;  %s409_s0 = inlined_call_operand.hbm [shape: f32[37], index: 0, kind: input, shape index: {}]   ;;  %s410_s1 = inlined_call_operand.vmem [shape: f32[2,128], index: 1, kind: input, shape index: {}]   ;;  %s411_s2 = inlined_call_operand.hbm [shape: f32[1,128], index: 2, kind: output, shape index: {}]  }
   0x1   :  { %8 = vsyncpa [#allocation3], 0  ;;  %s242_s11 = scalar_lea.hbm %s409_s0, 16 }
   0x2   :  { %p243_p0 = scmp.ne.s32.totalorder %s409_s0, %s242_s11  ;;  %p246_p1 = scmp.lt.u32.totalorder %s242_s11, %s409_s0 }
   0x4   :  { %p248_p2 = pnand %p246_p1, %p243_p0 }
   0x6   :  { %251 = shalt.err (!%p248_p2)
}
   0x7   :  { %s278_s16 = smov [#allocation2]  }
   0x8   :  { %16 = dma.hbm_to_smem %s409_s0, 16, %s278_s16, [#allocation4]  }
   0x9   :  { %274 = dma.done.wait [#allocation4], 16  }
   0xa   :  { %275 = vsyncadd [#allocation4], 4294967280 }
   0xb   :  { %22 = sfence }
   0xc   :  { %s24_s19 = sld [smem:[#allocation2]]  ;;  %s200_s20 = sld [smem:[#allocation2 + $0x4]]  ;;  %v23_v0 = vld [vmem:[%s410_s1] sm:$0x3] }
   0xd   :  { %s307_s21 = sld [smem:[#allocation2 + $0x8]]  ;;  %s202_s22 = sld [smem:[#allocation2 + $0x1]] }
   0xe   :  { %s203_s23 = sld [smem:[#allocation2 + $0x5]]  ;;  %s309_s24 = sld [smem:[#allocation2 + $0x9]] }
   0xf   :  { %s205_s25 = sld [smem:[#allocation2 + $0x2]]  ;;  %s206_s26 = sld [smem:[#allocation2 + $0x6]] }
  0x10   :  { %s314_s29 = sld [smem:[#allocation2 + $0xa]]  ;;  %s316_s0 = sld [smem:[#allocation2 + $0x3]] }
  0x11   :  { %s318_s30 = sld [smem:[#allocation2 + $0x7]]  ;;  %s320_s3 = sld [smem:[#allocation2 + $0xb]] }
  0x12   :  { %v25_v1 = vstv %s24_s19  ;;  %v28_v2 = vstv %s200_s20  ;;  %s322_s4 = sld [smem:[#allocation2 + $0xc]]  ;;  %s324_s5 = sld [smem:[#allocation2 + $0xd]] }
  0x13   :  { %v26_v3 = vmul.f32 %v25_v1, %v23_v0  ;;  %v29_v4 = vmul.f32 %v28_v2, %v23_v0  ;;  %v39_v5 = vstv %s202_s22  ;;  %s326_s6 = sld [smem:[#allocation2 + $0xe]]  ;;  %s328_s1 = sld [smem:[#allocation2 + $0xf]]  ;;  %v35_v6 = vstv %s307_s21 }
  0x14   :  { %v40_v7 = vmul.f32 %v39_v5, %v23_v0  ;;  %v42_v8 = vstv %s203_s23  ;;  %v49_v9 = vstv %s309_s24  ;;  %s332_s7 = sld [smem:[#allocation2 + $0x1c]]  ;;  %s334_s8 = sld [smem:[#allocation2 + $0x10]] }
  0x15   :  { %v31_v10 = vrot.slane %v29_v4, 1  ;;  %v43_v11 = vmul.f32 %v42_v8, %v23_v0  ;;  %v53_v12 = vstv %s205_s25  ;;  %v56_v13 = vstv %s206_s26  ;;  %s336_s9 = sld [smem:[#allocation2 + $0x11]]  ;;  %s338_s10 = sld [smem:[#allocation2 + $0x12]] }
  0x16   :  { %v54_v14 = vmul.f32 %v53_v12, %v23_v0  ;;  %v57_v15 = vmul.f32 %v56_v13, %v23_v0  ;;  %v63_v16 = vstv %s314_s29  ;;  %v67_v17 = vstv %s316_s0  ;;  %s342_s11 = sld [smem:[#allocation2 + $0x13]]  ;;  %s344_s12 = sld [smem:[#allocation2 + $0x1d]] }
  0x17   :  { %v33_v18 = vadd.f32 %v31_v10, %v26_v3  ;;  %v45_v19 = vrot.slane %v43_v11, 1  ;;  %v68_v20 = vmul.f32 %v67_v17, %v23_v0  ;;  %v70_v21 = vstv %s318_s30  ;;  %s347_s13 = sld [smem:[#allocation2 + $0x14]]  ;;  %s349_s14 = sld [smem:[#allocation2 + $0x15]] }
  0x18   :  { %v59_v22 = vrot.slane %v57_v15, 1  ;;  %v71_v23 = vmul.f32 %v70_v21, %v23_v0  ;;  %v77_v24 = vstv %s320_s3  ;;  %v81_v25 = vstv %s322_s4  ;;  %s353_s15 = sld [smem:[#allocation2 + $0x16]]  ;;  %s359_s16 = sld [smem:[#allocation2 + $0x17]] }
  0x19   :  { %v36_v26 = vadd.f32 %v35_v6, %v33_v18  ;;  %v47_v27 = vadd.f32 %v45_v19, %v40_v7  ;;  %v84_v28 = vstv %s324_s5  ;;  %v88_v29 = vstv %s326_s6  ;;  %s361_s17 = sld [smem:[#allocation2 + $0x1e]]  ;;  %s365_s18 = sld [smem:[#allocation2 + $0x18]] }
  0x1a   :  { %v61_v30 = vadd.f32 %v59_v22, %v54_v14  ;;  %v73_v31 = vrot.slane %v71_v23, 1  ;;  %v92_v32 = vstv %s328_s1  ;;  %v96_v33 = vstv %s332_s7  ;;  %s367_s19 = sld [smem:[#allocation2 + $0x19]]  ;;  %s371_s20 = sld [smem:[#allocation2 + $0x1a]] }
  0x1b   :  { %v37_v34 = vmax.f32 %v36_v26, 0.0  ;;  %v50_v35 = vadd.f32 %v49_v9, %v47_v27  ;;  %v100_v36 = vstv %s334_s8  ;;  %v103_v37 = vstv %s336_s9  ;;  %s373_s21 = sld [smem:[#allocation2 + $0x1b]]  ;;  %s379_s22 = sld [smem:[#allocation2 + $0x20]] }
  0x1c   :  { %v64_v38 = vadd.f32 %v63_v16, %v61_v30  ;;  %v75_v39 = vadd.f32 %v73_v31, %v68_v20  ;;  %v107_v40 = vstv %s338_s10  ;;  %v111_v41 = vstv %s342_s11  ;;  %s381_s23 = sld [smem:[#allocation2 + $0x21]]  ;;  %s383_s24 = sld [smem:[#allocation2 + $0x22]] }
  0x1d   :  { %v51_v42 = vmax.f32 %v50_v35, 0.0  ;;  %v82_v43 = vmul.f32 %v81_v25, %v37_v34  ;;  %v101_v44 = vmul.f32 %v100_v36, %v37_v34  ;;  %v115_v45 = vstv %s344_s12  ;;  %s387_s25 = sld [smem:[#allocation2 + $0x1f]]  ;;  %s234_s26 = sld [smem:[#allocation2 + $0x23]] }
  0x1e   :  { %v65_v46 = vmax.f32 %v64_v38, 0.0  ;;  %v78_v47 = vadd.f32 %v77_v24, %v75_v39  ;;  %v119_v48 = vstv %s347_s13  ;;  %v122_v49 = vstv %s349_s14  ;;  %s235_s27 = sld [smem:[#allocation2 + $0x24]]  ;;  %s279_s28 = smov [#allocation5]  }
  0x1f   :  { %v85_v50 = vmul.f32 %v84_v28, %v51_v42  ;;  %v104_v51 = vmul.f32 %v103_v37, %v51_v42  ;;  %v120_v52 = vmul.f32 %v119_v48, %v37_v34  ;;  %v123_v53 = vmul.f32 %v122_v49, %v51_v42  ;;  %s191_s29 = sshll.u32 %s279_s28, 4  ;;  %s192_s29 = int_to_ptr.vmem [resolvable:$true] %s191_s29 }
  0x20   :  { %v79_v54 = vmax.f32 %v78_v47, 0.0  ;;  %v89_v55 = vmul.f32 %v88_v29, %v65_v46  ;;  %v108_v56 = vmul.f32 %v107_v40, %v65_v46  ;;  %v126_v57 = vstv %s353_s15  ;;  %s252_s0 = scalar_lea.vmem %s192_s29, 16  ;;  %s256_s30 = scalar_lea.vmem %s192_s29, 32 }
  0x21   :  { %v86_v58 = vadd.f32 %v85_v50, %v82_v43  ;;  %v105_v59 = vadd.f32 %v104_v51, %v101_v44  ;;  %v124_v60 = vadd.f32 %v123_v53, %v120_v52  ;;  %v127_v61 = vmul.f32 %v126_v57, %v65_v46  ;;  %p253_p3 = scmp.ne.s32.totalorder %s192_s29, %s252_s0  ;;  %p257_p4 = scmp.lt.s32.totalorder %s192_s29, %s192_s29 }
  0x22   :  { %v93_v62 = vmul.f32 %v92_v32, %v79_v54  ;;  %v112_v63 = vmul.f32 %v111_v41, %v79_v54  ;;  %v130_v0 = vstv %s359_s16  ;;  %v134_v1 = vstv %s361_s17  ;;  %p258_p5 = scmp.lt.s32.totalorder %s256_s30, %s252_s0 }
  0x23   :  { %v90_v2 = vadd.f32 %v89_v55, %v86_v58  ;;  %v109_v3 = vadd.f32 %v108_v56, %v105_v59  ;;  %v128_v4 = vadd.f32 %v127_v61, %v124_v60  ;;  %v131_v5 = vmul.f32 %v130_v0, %v79_v54 }
  0x24   :  { %v138_v6 = vstv %s365_s18  ;;  %v141_v7 = vstv %s367_s19  ;;  %v145_v8 = vstv %s371_s20  ;;  %v149_v9 = vstv %s373_s21  ;;  %p259_p6 = por %p258_p5, %p257_p4 }
  0x25   :  { %v94_v10 = vadd.f32 %v93_v62, %v90_v2  ;;  %v113_v11 = vadd.f32 %v112_v63, %v109_v3  ;;  %v132_v12 = vadd.f32 %v131_v5, %v128_v4  ;;  %v139_v13 = vmul.f32 %v138_v6, %v37_v34 }
  0x26   :  { %v142_v14 = vmul.f32 %v141_v7, %v51_v42  ;;  %v146_v15 = vmul.f32 %v145_v8, %v65_v46  ;;  %v150_v20 = vmul.f32 %v149_v9, %v79_v54  ;;  %v157_v21 = vstv %s379_s22  ;;  %p260_p7 = pnand %p259_p6, %p253_p3 }
  0x27   :  { %v97_v16 = vadd.f32 %v96_v33, %v94_v10  ;;  %v116_v17 = vadd.f32 %v115_v45, %v113_v11  ;;  %v135_v18 = vadd.f32 %v134_v1, %v132_v12  ;;  %v160_v22 = vstv %s381_s23 }
  0x28   :  { %v143_v19 = vadd.f32 %v142_v14, %v139_v13  ;;  %v164_v26 = vstv %s383_s24  ;;  %v153_v28 = vstv %s387_s25  ;;  %v168_v35 = vstv %s234_s26 }
  0x29   :  { %v98_v23 = vmax.f32 %v97_v16, 0.0  ;;  %v117_v24 = vmax.f32 %v116_v17, 0.0  ;;  %v136_v25 = vmax.f32 %v135_v18, 0.0  ;;  %v172_v39 = vstv %s235_s27 }
  0x2a   :  { %v147_v27 = vadd.f32 %v146_v15, %v143_v19 }
  0x2b   :  { %v158_v29 = vmul.f32 %v157_v21, %v98_v23  ;;  %v161_v30 = vmul.f32 %v160_v22, %v117_v24  ;;  %v165_v32 = vmul.f32 %v164_v26, %v136_v25 }
  0x2c   :  { %v151_v31 = vadd.f32 %v150_v20, %v147_v27 }
  0x2d   :  { %v162_v34 = vadd.f32 %v161_v30, %v158_v29 }
  0x2e   :  { %v154_v33 = vadd.f32 %v153_v28, %v151_v31 }
  0x2f   :  { %v166_v37 = vadd.f32 %v165_v32, %v162_v34 }
  0x30   :  { %v155_v36 = vmax.f32 %v154_v33, 0.0 }
  0x32   :  { %v169_v38 = vmul.f32 %v168_v35, %v155_v36 }
  0x34   :  { %v170_v40 = vadd.f32 %v169_v38, %v166_v37 }
  0x36   :  { %v173_v41 = vadd.f32 %v172_v39, %v170_v40 }
  0x38   :  { %v174_v42 = vand.u32 2147483647, %v173_v41  ;;  %vm181_vm0 = vcmp.ge.f32.partialorder %v173_v41, 0.0 }
  0x3a   :  { %v175_v43 = vsub.f32 0.0, %v174_v42 }
  0x3c   :  { %v176_v44 = vmul.f32 1.442695, %v175_v43 }
  0x3e   :  { %238 = vpow2.f32 %v176_v44 }
  0x48   :  { %v239_v45 = vpop.eup %238 }
  0x49   :  { %v178_v46 = vadd.f32 1.0, %v239_v45 }
  0x4b   :  { %240 = vrcp.f32 %v178_v46 }
  0x55   :  { %v241_v47 = vpop.eup %240 }
  0x56   :  { %v182_v48 = vmul.f32 %v241_v47, %v239_v45 }
  0x58   :  { %v183_v49 = vsel %vm181_vm0, %v241_v47, %v182_v48 }
  0x59   :  { %184 = vst [vmem:[#allocation5] sm:$0x1] %v183_v49 }
  0x5a   :  { %263 = shalt.err (!%p260_p7)
}
  0x5b   :  { %s264_s5 = scalar_lea.hbm %s411_s2, 16 }
  0x5c   :  { %p265_p8 = scmp.ne.s32.totalorder %s411_s2, %s264_s5  ;;  %p268_p9 = scmp.lt.u32.totalorder %s264_s5, %s411_s2 }
  0x5e   :  { %p270_p10 = pnand %p268_p9, %p265_p8 }
  0x60   :  { %273 = shalt.err (!%p270_p10)
}
  0x61   :  { %194 = dma.vmem_to_hbm [thread:$0]  %s192_s29, 16, %s411_s2, [#allocation3]  }
  0x62   :  { %276 = dma.done.wait [#allocation3], 16  }
  0x63   :  { %277 = vsyncadd [#allocation3], 4294967280 }
  0x64   :  { %198 = vsyncpa [#allocation3], 1 }
  0x65   :  { %199 = vsyncpa [#allocation4], 1 }

</bundles_post_ra>
